<compile_context>
chip_gen: v6e
topology: v6e:2x2x1
jax: 0.10.0
libtpu: 0.0.40
codegen_flags: <defaults>
</compile_context>

<pallas_src>
import jax
import jax.numpy as jnp
from jax.experimental import pallas as pl
from jax.experimental.pallas import tpu as pltpu


def generator_kernel(z_ref, w1_ref, b1_ref, w2_ref, b2_ref, w3_ref, b3_ref, out_ref):
    """One batch tile of the 3-layer MLP.

    Layout: batch on the sublane (second-to-last) axis, features on lanes.
      z_ref : (bm, latent_dim)   f32 input tile (straight from the caller's array)
      w*    : (in, out)          weights, compute dtype
      b*    : (1, out)           f32 biases (broadcast over the batch sublanes)
      out   : (bm, output_dim)
    """
    x = z_ref[...].astype(w1_ref.dtype)                                  # (bm, L)
    h = jnp.dot(x, w1_ref[...], preferred_element_type=jnp.float32)
    h = jnp.maximum(h + b1_ref[...], 0.0)                                # (bm, 16)
    h = jnp.dot(h.astype(w2_ref.dtype), w2_ref[...],
                preferred_element_type=jnp.float32)
    h = jnp.maximum(h + b2_ref[...], 0.0)                                # (bm, 32)
    out = jnp.dot(h.astype(w3_ref.dtype), w3_ref[...],
                  preferred_element_type=jnp.float32)
    out_ref[...] = (out + b3_ref[...]).astype(out_ref.dtype)            # (bm, D_out)


def _round_up(x, m):
    return ((x + m - 1) // m) * m


def _choose_batch_tile(B, bm_max):
    """One full-extent tile for small/medium batches (grid = 1 -> no extra
    per-step overhead on single-TensorCore chips); otherwise bm_max-row tiles
    (bm_max is a multiple of 128, so the (8,128) rule is always satisfied)."""
    if B <= bm_max:
        return B, B
    return bm_max, _round_up(B, bm_max)


def generator_forward(z, params, *, bm_max=4096, compute_dtype=jnp.float32,
                      out_dtype=jnp.float32, core_parallel=False):
    """z: (B, latent_dim) float32. Returns (B, output_dim) in `out_dtype`.

    params = (w1, b1, w2, b2, w3, b3) with weights stored (out, in) — the
    torch.nn.Linear convention — and biases as (out,).
    """
    w1, b1, w2, b2, w3, b3 = params
    B, latent_dim = z.shape
    output_dim = w3.shape[0]

    bm, b_pad = _choose_batch_tile(B, bm_max)
    grid = (b_pad // bm,)

    # Only pad when the batch is both large and ragged w.r.t. the tile.
    if b_pad > B:
        z = jnp.pad(z, ((0, b_pad - B), (0, 0)))

    # Tiny parameter reshapes/casts (<= 32x32): negligible, done once per call.
    w1c = w1.T.astype(compute_dtype)                 # (latent_dim, 16)
    w2c = w2.T.astype(compute_dtype)                 # (16, 32)
    w3c = w3.T.astype(compute_dtype)                 # (32, output_dim)
    b1c = b1.reshape(1, -1).astype(jnp.float32)
    b2c = b2.reshape(1, -1).astype(jnp.float32)
    b3c = b3.reshape(1, -1).astype(jnp.float32)

    def resident(arr):
        # Constant block index -> fetched once, stays VMEM-resident for all steps.
        return pl.BlockSpec(arr.shape, lambda i: (0, 0))

    # v7x: set core_parallel=True to shard the batch grid across both
    # TensorCores; plain PARALLEL is the safe default on all generations.
    batch_sem = pltpu.CORE_PARALLEL if core_parallel else pltpu.PARALLEL

    out = pl.pallas_call(
        generator_kernel,
        out_shape=jax.ShapeDtypeStruct((b_pad, output_dim), out_dtype),
        grid_spec=pltpu.PrefetchScalarGridSpec(
            num_scalar_prefetch=0,
            grid=grid,
            in_specs=[
                pl.BlockSpec((bm, latent_dim), lambda i: (i, 0)),   # z tile
                resident(w1c), resident(b1c),
                resident(w2c), resident(b2c),
                resident(w3c), resident(b3c),
            ],
            out_specs=pl.BlockSpec((bm, output_dim), lambda i: (i, 0)),
        ),
        compiler_params=pltpu.CompilerParams(
            dimension_semantics=(batch_sem,),
            # Lane-padded f32 blocks at bm=4096 (in + out double-buffered plus
            # compiler temporaries) stay well under 32 MiB; explicit limit keeps
            # v5e (16 MiB default scoped VMEM) happy and is v7x-safe (<64 MiB).
            vmem_limit_bytes=32 * 1024 * 1024,
        ),
    )(z, w1c, b1c, w2c, b2c, w3c, b3c)

    return out[:B] if b_pad > B else out


def init_generator_params(key, latent_dim, output_dim):
    """Deterministic synthetic parameters matching the PyTorch module's shapes
    (weights stored (out, in), exactly like torch.nn.Linear.weight)."""
    k1, k2, k3, k4, k5, k6 = jax.random.split(key, 6)
    w1 = jax.random.normal(k1, (16, latent_dim), jnp.float32) * 0.1
    b1 = jax.random.normal(k2, (16,), jnp.float32) * 0.1
    w2 = jax.random.normal(k3, (32, 16), jnp.float32) * 0.1
    b2 = jax.random.normal(k4, (32,), jnp.float32) * 0.1
    w3 = jax.random.normal(k5, (output_dim, 32), jnp.float32) * 0.1
    b3 = jax.random.normal(k6, (output_dim,), jnp.float32) * 0.1
    return (w1, b1, w2, b2, w3, b3)


def generator_reference(z, params):
    """Pure-JAX f32 reference (mirrors the PyTorch module)."""
    w1, b1, w2, b2, w3, b3 = params
    h = jnp.maximum(z @ w1.T + b1, 0.0)
    h = jnp.maximum(h @ w2.T + b2, 0.0)
    return h @ w3.T + b3


if __name__ == "__main__":
    latent_dim = 8
    output_dim = 4
    batch = 16

    key = jax.random.PRNGKey(0)
    k_params, k_z = jax.random.split(key)
    params = init_generator_params(k_params, latent_dim, output_dim)
    z = jax.random.normal(k_z, (batch, latent_dim), jnp.float32)

    out = jax.block_until_ready(generator_forward(z, params))

    ref = generator_reference(z, params)
    assert out.shape == (batch, output_dim)
    assert jnp.allclose(out, ref, atol=1e-2, rtol=1e-2), "mismatch vs reference"

    print("KERNEL_OK")
</pallas_src>

<mosaic_0001>
module attributes {stable_mosaic.version = 11 : i64} {
  func.func @generator_kernel(%arg0: i32, %arg1: memref<16x8xf32, #tpu.memory_space<vmem>>, %arg2: memref<8x16xf32, #tpu.memory_space<vmem>>, %arg3: memref<1x16xf32, #tpu.memory_space<vmem>>, %arg4: memref<16x32xf32, #tpu.memory_space<vmem>>, %arg5: memref<1x32xf32, #tpu.memory_space<vmem>>, %arg6: memref<32x4xf32, #tpu.memory_space<vmem>>, %arg7: memref<1x4xf32, #tpu.memory_space<vmem>>, %arg8: memref<16x4xf32, #tpu.memory_space<vmem>>) attributes {dimension_semantics = [#tpu.dimension_semantics<parallel>], iteration_bounds = array<i64: 1>, scalar_prefetch = 0 : i64, scratch_operands = 0 : i64, tpu.core_type = #tpu.core_type<tc>, window_params = [{transform_indices = @transform_0, window_bounds = array<i64: 16, 8>}, {pipeline_mode = #tpu.pipeline_mode<synchronous>, transform_indices = @transform_1, window_bounds = array<i64: 8, 16>}, {pipeline_mode = #tpu.pipeline_mode<synchronous>, transform_indices = @transform_2, window_bounds = array<i64: 1, 16>}, {pipeline_mode = #tpu.pipeline_mode<synchronous>, transform_indices = @transform_3, window_bounds = array<i64: 16, 32>}, {pipeline_mode = #tpu.pipeline_mode<synchronous>, transform_indices = @transform_4, window_bounds = array<i64: 1, 32>}, {pipeline_mode = #tpu.pipeline_mode<synchronous>, transform_indices = @transform_5, window_bounds = array<i64: 32, 4>}, {pipeline_mode = #tpu.pipeline_mode<synchronous>, transform_indices = @transform_6, window_bounds = array<i64: 1, 4>}, {transform_indices = @transform_7, window_bounds = array<i64: 16, 4>}]} {
    %c0 = arith.constant 0 : index
    %c0_0 = arith.constant 0 : index
    %0 = vector.load %arg1[%c0, %c0_0] : memref<16x8xf32, #tpu.memory_space<vmem>>, vector<16x8xf32>
    %c0_1 = arith.constant 0 : index
    %c0_2 = arith.constant 0 : index
    %1 = vector.load %arg2[%c0_1, %c0_2] : memref<8x16xf32, #tpu.memory_space<vmem>>, vector<8x16xf32>
    %cst = arith.constant dense<0.000000e+00> : vector<16x16xf32>
    %2 = tpu.matmul %0, %1, %cst {dimension_numbers = #tpu.dot_dimension_numbers<[1], [0], [0], [1], [0, 0, 1, 1], [], []>} : vector<16x8xf32>, vector<8x16xf32>, vector<16x16xf32> -> vector<16x16xf32>
    %c0_3 = arith.constant 0 : index
    %c0_4 = arith.constant 0 : index
    %3 = vector.load %arg3[%c0_3, %c0_4] : memref<1x16xf32, #tpu.memory_space<vmem>>, vector<1x16xf32>
    %4 = vector.broadcast %3 : vector<1x16xf32> to vector<16x16xf32>
    %5 = arith.addf %2, %4 : vector<16x16xf32>
    %cst_5 = arith.constant 0.000000e+00 : f32
    %6 = vector.broadcast %cst_5 : f32 to vector<16x16xf32>
    %7 = arith.maximumf %5, %6 : vector<16x16xf32>
    %c0_6 = arith.constant 0 : index
    %c0_7 = arith.constant 0 : index
    %8 = vector.load %arg4[%c0_6, %c0_7] : memref<16x32xf32, #tpu.memory_space<vmem>>, vector<16x32xf32>
    %cst_8 = arith.constant dense<0.000000e+00> : vector<16x32xf32>
    %9 = tpu.matmul %7, %8, %cst_8 {dimension_numbers = #tpu.dot_dimension_numbers<[1], [0], [0], [1], [0, 0, 1, 1], [], []>} : vector<16x16xf32>, vector<16x32xf32>, vector<16x32xf32> -> vector<16x32xf32>
    %c0_9 = arith.constant 0 : index
    %c0_10 = arith.constant 0 : index
    %10 = vector.load %arg5[%c0_9, %c0_10] : memref<1x32xf32, #tpu.memory_space<vmem>>, vector<1x32xf32>
    %11 = vector.broadcast %10 : vector<1x32xf32> to vector<16x32xf32>
    %12 = arith.addf %9, %11 : vector<16x32xf32>
    %cst_11 = arith.constant 0.000000e+00 : f32
    %13 = vector.broadcast %cst_11 : f32 to vector<16x32xf32>
    %14 = arith.maximumf %12, %13 : vector<16x32xf32>
    %c0_12 = arith.constant 0 : index
    %c0_13 = arith.constant 0 : index
    %15 = vector.load %arg6[%c0_12, %c0_13] : memref<32x4xf32, #tpu.memory_space<vmem>>, vector<32x4xf32>
    %cst_14 = arith.constant dense<0.000000e+00> : vector<16x4xf32>
    %16 = tpu.matmul %14, %15, %cst_14 {dimension_numbers = #tpu.dot_dimension_numbers<[1], [0], [0], [1], [0, 0, 1, 1], [], []>} : vector<16x32xf32>, vector<32x4xf32>, vector<16x4xf32> -> vector<16x4xf32>
    %c0_15 = arith.constant 0 : index
    %c0_16 = arith.constant 0 : index
    %17 = vector.load %arg7[%c0_15, %c0_16] : memref<1x4xf32, #tpu.memory_space<vmem>>, vector<1x4xf32>
    %18 = vector.broadcast %17 : vector<1x4xf32> to vector<16x4xf32>
    %19 = arith.addf %16, %18 : vector<16x4xf32>
    %c0_17 = arith.constant 0 : index
    %c0_18 = arith.constant 0 : index
    %20 = vector.load %arg8[%c0_17, %c0_18] : memref<16x4xf32, #tpu.memory_space<vmem>>, vector<16x4xf32>
    tpu.vector_store %arg8[%c0_17, %c0_18], %19 {strides = array<i32>} : memref<16x4xf32, #tpu.memory_space<vmem>>, vector<16x4xf32>,
    return
  }
  func.func @transform_0(%arg0: i32) -> (i32, i32) {
    %c0_i32 = arith.constant 0 : i32
    %c0_i32_0 = arith.constant 0 : i32
    return %arg0, %c0_i32 : i32, i32
  }
  func.func @transform_1(%arg0: i32) -> (i32, i32) {
    %c0_i32 = arith.constant 0 : i32
    %c0_i32_0 = arith.constant 0 : i32
    %c0_i32_1 = arith.constant 0 : i32
    return %c0_i32, %c0_i32_0 : i32, i32
  }
  func.func @transform_2(%arg0: i32) -> (i32, i32) {
    %c0_i32 = arith.constant 0 : i32
    %c0_i32_0 = arith.constant 0 : i32
    %c0_i32_1 = arith.constant 0 : i32
    return %c0_i32, %c0_i32_0 : i32, i32
  }
  func.func @transform_3(%arg0: i32) -> (i32, i32) {
    %c0_i32 = arith.constant 0 : i32
    %c0_i32_0 = arith.constant 0 : i32
    %c0_i32_1 = arith.constant 0 : i32
    return %c0_i32, %c0_i32_0 : i32, i32
  }
  func.func @transform_4(%arg0: i32) -> (i32, i32) {
    %c0_i32 = arith.constant 0 : i32
    %c0_i32_0 = arith.constant 0 : i32
    %c0_i32_1 = arith.constant 0 : i32
    return %c0_i32, %c0_i32_0 : i32, i32
  }
  func.func @transform_5(%arg0: i32) -> (i32, i32) {
    %c0_i32 = arith.constant 0 : i32
    %c0_i32_0 = arith.constant 0 : i32
    %c0_i32_1 = arith.constant 0 : i32
    return %c0_i32, %c0_i32_0 : i32, i32
  }
  func.func @transform_6(%arg0: i32) -> (i32, i32) {
    %c0_i32 = arith.constant 0 : i32
    %c0_i32_0 = arith.constant 0 : i32
    %c0_i32_1 = arith.constant 0 : i32
    return %c0_i32, %c0_i32_0 : i32, i32
  }
  func.func @transform_7(%arg0: i32) -> (i32, i32) {
    %c0_i32 = arith.constant 0 : i32
    %c0_i32_0 = arith.constant 0 : i32
    return %arg0, %c0_i32 : i32, i32
  }
}

</mosaic_0001>

<bundles_post_ra>
// kernel: tpu_custom_call.1
= control target key start
LH: loop header
LB: loop body
LE: loop exit
PB: predicated region body
PF: predicated region fallthrough
CT: control target
= control target key end

     0   :  { %vm36_vm0 = vcmask 64512   ;;  %vm129_vm1 = vcmask 130048   ;;  %vm224_vm2 = vcmask 261120   ;;  %vm306_vm3 = vcmask 31744   ;;  %s440_s1 = inlined_call_operand.vmem [shape: f32[8,16], index: 1, kind: input, shape index: {}]   ;;  %s441_s0 = inlined_call_operand.vmem [shape: f32[16,8], index: 0, kind: input, shape index: {}]   ;;  %s442_s3 = inlined_call_operand.vmem [shape: f32[16,32], index: 3, kind: input, shape index: {}]   ;;  %s443_s2 = inlined_call_operand.vmem [shape: f32[1,16], index: 2, kind: input, shape index: {}]   ;;  %s444_s5 = inlined_call_operand.vmem [shape: f32[32,4], index: 5, kind: input, shape index: {}]   ;;  %s445_s4 = inlined_call_operand.vmem [shape: f32[1,32], index: 4, kind: input, shape index: {}]   ;;  %s446_s6 = inlined_call_operand.vmem [shape: f32[1,4], index: 6, kind: input, shape index: {}]   ;;  %s447_s7 = inlined_call_operand.vmem [shape: f32[16,4], index: 7, kind: output, shape index: {}]  }
   0x1   :  { %v28_v0 = vld [vmem:[%s440_s1] sm:$0xff]  ;;  %v27_v2 = vld [vmem:[%s441_s0 + $0x8] sm:$0xff]  ;;  %v216_v12 = vld [vmem:[%s444_s5 + $0x18] sm:$0xff] }
   0x2   :  { %v26_v1 = vld [vmem:[%s441_s0] sm:$0xff]  ;;  %335 = vmatprep.subr.mxu1 %v28_v0  ;;  %v121_v3 = vld [vmem:[%s442_s3 + $0x8] sm:$0xff]  ;;  %347 = vmatprep.subr.mxu0 %v216_v12  ;;  %v215_v13 = vld [vmem:[%s444_s5 + $0x10] sm:$0xff] }
   0x3   :  { %337 = vmatprep.mubr.msk.f32.mxu1 %vm36_vm0, %v26_v1  ;;  %336 = vmatpush3.msra.mxu1 %v28_v0  ;;  %v120_v4 = vld [vmem:[%s442_s3] sm:$0xff]  ;;  %v214_v14 = vld [vmem:[%s444_s5 + $0x8] sm:$0xff] }
   0x4   :  { %338 = vmatmul.mubr.msk.f32.vlgmr.msra.gmra.mxu1 %vm36_vm0, %v27_v2  ;;  %340 = vmatprep.subr.mxu1 %v121_v3  ;;  %v313_v5 = vld [vmem:[%s443_s2] ss:$0 sm:$0xff] }
   0x5   :  { %341 = vmatpush3.msra.mxu1 %v121_v3  ;;  %348 = vmatpush3.msra.mxu0 %v216_v12  ;;  %v213_v15 = vld [vmem:[%s444_s5] sm:$0xff] }
   0x6   :  { %342 = vmatprep.subr.mxu1 %v120_v4  ;;  %349 = vmatprep.subr.mxu0 %v215_v13  ;;  %v316_v16 = vld [vmem:[%s445_s4] ss:$0 sm:$0xff] }
   0x7   :  { %343 = vmatpush3.msra.mxu1 %v120_v4  ;;  %350 = vmatpush3.msra.mxu0 %v215_v13  ;;  %v319_v23 = vld [vmem:[%s446_s6] ss:$0 sm:$0xff] }
   0x8   :  { %351 = vmatprep.subr.mxu0 %v214_v14 }
   0x9   :  { %352 = vmatpush3.msra.mxu0 %v214_v14 }
   0xa   :  { %353 = vmatprep.subr.mxu0 %v213_v15 }
   0xb   :  { %354 = vmatpush3.msra.mxu0 %v213_v15 }
  0xc4   :  { %v339_v6 = vpop.f32.mrf.mxu1 }
  0xc5   :  { %v115_v7 = vadd.f32 %v339_v6, %v313_v5 }
  0xc6   :  { %v109_v8 = vpop.f32.mrf.mxu1 }
  0xc7   :  { %v110_v9 = vadd.f32 %v313_v5, %v109_v8  ;;  %v119_v11 = vmax.f32 %v115_v7, 0.0 }
  0xc9   :  { %v118_v10 = vmax.f32 %v110_v9, 0.0 }
  0xcb   :  { %344 = vmatprep.mubr.msk.f32.mxu1 %vm129_vm1, %v118_v10 }
  0xcc   :  { %345 = vmatmul.mubr.msk.f32.vlgmr.msra.gmra.mxu1 %vm129_vm1, %v119_v11 }
 0x18c   :  { %v346_v17 = vpop.f32.mrf.mxu1 }
 0x18d   :  { %v208_v18 = vadd.f32 %v346_v17, %v316_v16 }
 0x18e   :  { %v202_v19 = vpop.f32.mrf.mxu1 }
 0x18f   :  { %v203_v20 = vadd.f32 %v316_v16, %v202_v19  ;;  %v212_v22 = vmax.f32 %v208_v18, 0.0 }
 0x191   :  { %v211_v21 = vmax.f32 %v203_v20, 0.0 }
 0x193   :  { %355 = vmatprep.mubr.msk.f32.mxu0 %vm224_vm2, %v211_v21 }
 0x194   :  { %356 = vmatmul.mubr.msk.f32.vlgmr.msra.gmra.mxu0 %vm224_vm2, %v212_v22 }
 0x254   :  { %v357_v24 = vpop.f32.mrf.mxu0 }
 0x255   :  { %v303_v25 = vadd.f32 %v357_v24, %v319_v23 }
 0x256   :  { %v297_v26 = vpop.f32.mrf.mxu0 }
 0x257   :  { %308 = vst.msk [vmem:[%s447_s7 + $0x8] sm:$0xff] %vm306_vm3, %v303_v25  ;;  %v298_v27 = vadd.f32 %v319_v23, %v297_v26 }
 0x259   :  { %307 = vst.msk [vmem:[%s447_s7] sm:$0xff] %vm306_vm3, %v298_v27 }

</bundles_post_ra>
